<compile_context>
chip_gen: v6e
topology: v6e:2x2x1
jax: 0.10.0
libtpu: 0.0.40
codegen_flags: <defaults>
</compile_context>

<pallas_src>
import functools
import math

import jax
import jax.numpy as jnp
import numpy as np
from jax.experimental import pallas as pl
from jax.experimental.pallas import tpu as pltpu

_LANES = 128
_SUBLANES = 8
_MAX_BLOCK_ROWS = 8192        # (8192, 128) f32 tile = 4 MiB per input per buffer
_MIN_ROWS_FOR_SPLIT = 1024    # force >= 2 grid blocks above this (v7x: 2 TCs)
_VMEM_LIMIT_BYTES = 32 * 1024 * 1024


def _round_up(x, m):
    return ((x + m - 1) // m) * m


def _half_tanh_diff(p_ref, t_ref):
    # sigmoid(x) = 0.5*tanh(0.5*x) + 0.5 ; the +0.5 terms cancel in the
    # difference, so sigmoid(p) - sigmoid(t) = 0.5*(tanh(0.5p) - tanh(0.5t)).
    # Refs are loaded in native dtype and cast to f32 here (cheap VPU convert).
    p = p_ref[...].astype(jnp.float32)
    t = t_ref[...].astype(jnp.float32)
    return 0.5 * (jnp.tanh(0.5 * p) - jnp.tanh(0.5 * t))


def _partial_sum_kernel(p_ref, t_ref, out_ref, *, rows, tm):
    d = _half_tanh_diff(p_ref, t_ref)
    sq = d * d                                            # (tm, 128) f32
    if rows % tm != 0:
        # Last grid block hangs off the end of the array: those VMEM rows hold
        # unspecified data (Pallas only DMAs the in-bounds region), zero them.
        row_ids = pl.program_id(0) * tm + jax.lax.broadcasted_iota(
            jnp.int32, (tm, _LANES), 0)
        sq = jnp.where(row_ids < rows, sq, 0.0)
    # Fold the row axis in vreg-sized (8,128) chunks: the reshape matches the
    # native (8,128) vreg tiling (no relayout) and the sum is pure VPU adds --
    # no per-step cross-lane XLU reduce, no scalar read-modify-write.
    out_ref[0] = jnp.sum(sq.reshape(tm // _SUBLANES, _SUBLANES, _LANES), axis=0)


def _elementwise_kernel(p_ref, t_ref, out_ref):
    # No tail masking needed: out-of-bounds rows of the partial last block are
    # simply not written back by Pallas, so the exact-size output stays clean.
    d = _half_tanh_diff(p_ref, t_ref)
    out_ref[...] = d * d


def target_logistic_mse_loss(pred, target, reduction="mean"):
    """loss = mse(sigmoid(pred.float()), sigmoid(target.float()));
    reduction in {'mean', 'sum', 'none'}."""
    assert pred.shape == target.shape, (pred.shape, target.shape)
    n_elem = int(math.prod(pred.shape)) if pred.shape else 1

    # Lane-dense (rows, 128) view. Fast path (numel % 128 == 0 and >= one
    # (8,128) tile): pure reshape, zero extra HBM traffic.
    rows = max(pl.cdiv(n_elem, _LANES), _SUBLANES)
    pad_elems = rows * _LANES - n_elem

    def to_2d(x):
        flat = x.reshape(-1)
        if pad_elems:
            # Rare slow path: < 1 KiB of zero pad; sigmoid(0)-sigmoid(0)=0 so
            # padded elements contribute nothing to the sum.
            flat = jnp.pad(flat, (0, pad_elems))
        return flat.reshape(rows, _LANES)

    p2 = to_2d(pred)
    t2 = to_2d(target)

    # Balanced block sizing: biggest tiles that fit comfortably in VMEM on all
    # generations, >= 2 blocks for mid/large inputs (v7x dual TensorCore), and
    # tm ~ rows/num_blocks so the ragged tail never doubles the traffic.
    if rows <= _MIN_ROWS_FOR_SPLIT:
        num_blocks = 1
    else:
        num_blocks = max(2, pl.cdiv(rows, _MAX_BLOCK_ROWS))
    tm = _round_up(pl.cdiv(rows, num_blocks), _SUBLANES)
    tm = min(tm, (rows // _SUBLANES) * _SUBLANES)   # keep block within array
    num_blocks = pl.cdiv(rows, tm)

    in_specs = [
        pl.BlockSpec((tm, _LANES), lambda i: (i, 0)),
        pl.BlockSpec((tm, _LANES), lambda i: (i, 0)),
    ]
    compiler_params = pltpu.CompilerParams(
        dimension_semantics=("parallel",),
        vmem_limit_bytes=_VMEM_LIMIT_BYTES,
    )
    in_bytes = n_elem * (pred.dtype.itemsize + target.dtype.itemsize)

    if reduction in ("mean", "sum"):
        kernel = functools.partial(_partial_sum_kernel, rows=rows, tm=tm)
        partials = pl.pallas_call(
            kernel,
            out_shape=jax.ShapeDtypeStruct(
                (num_blocks, _SUBLANES, _LANES), jnp.float32),
            grid_spec=pltpu.PrefetchScalarGridSpec(
                num_scalar_prefetch=0,
                grid=(num_blocks,),
                in_specs=in_specs,
                out_specs=pl.BlockSpec(
                    (1, _SUBLANES, _LANES), lambda i: (i, 0, 0)),
            ),
            compiler_params=compiler_params,
            cost_estimate=pl.CostEstimate(
                flops=6 * n_elem,
                transcendentals=2 * n_elem,
                bytes_accessed=in_bytes + num_blocks * _SUBLANES * _LANES * 4,
            ),
        )(p2, t2)
        total = jnp.sum(partials)     # tiny (num_blocks, 8, 128) tree-sum
        if reduction == "mean":
            return total / n_elem
        return total

    if reduction == "none":
        sq = pl.pallas_call(
            _elementwise_kernel,
            out_shape=jax.ShapeDtypeStruct((rows, _LANES), jnp.float32),
            grid_spec=pltpu.PrefetchScalarGridSpec(
                num_scalar_prefetch=0,
                grid=(num_blocks,),
                in_specs=in_specs,
                out_specs=pl.BlockSpec((tm, _LANES), lambda i: (i, 0)),
            ),
            compiler_params=compiler_params,
            cost_estimate=pl.CostEstimate(
                flops=5 * n_elem,
                transcendentals=2 * n_elem,
                bytes_accessed=in_bytes + n_elem * 4,
            ),
        )(p2, t2)
        if pad_elems:
            return sq.reshape(-1)[:n_elem].reshape(pred.shape)
        return sq.reshape(pred.shape)   # free reshape, no extra pass

    raise ValueError(f"unsupported reduction: {reduction!r}")


def _reference(pred, target, reduction="mean"):
    """Pure-JAX mirror of the PyTorch module."""
    sp = jax.nn.sigmoid(pred.astype(jnp.float32))
    st = jax.nn.sigmoid(target.astype(jnp.float32))
    sq = (sp - st) ** 2
    if reduction == "mean":
        return jnp.mean(sq)
    if reduction == "sum":
        return jnp.sum(sq)
    return sq


if __name__ == "__main__":
    key = jax.random.PRNGKey(0)
    k1, k2 = jax.random.split(key)
    N, C, H, W = 2, 4, 16, 16
    pred = jax.random.normal(k1, (N, C, H, W), dtype=jnp.float32) * 2.0
    target = jax.random.normal(k2, (N, C, H, W), dtype=jnp.float32) * 2.0

    # reduction='mean' (module default)
    loss = jax.block_until_ready(target_logistic_mse_loss(pred, target))
    ref = jax.block_until_ready(_reference(pred, target))
    assert np.allclose(np.asarray(loss), np.asarray(ref), rtol=1e-4, atol=1e-6), (
        float(loss), float(ref))

    # reduction='sum'
    s = jax.block_until_ready(
        target_logistic_mse_loss(pred, target, reduction="sum"))
    s_ref = jax.block_until_ready(_reference(pred, target, reduction="sum"))
    assert np.allclose(np.asarray(s), np.asarray(s_ref), rtol=1e-4, atol=1e-5), (
        float(s), float(s_ref))

    # reduction='none' (elementwise path, exact-size output)
    sq = jax.block_until_ready(
        target_logistic_mse_loss(pred, target, reduction="none"))
    sq_ref = jax.block_until_ready(_reference(pred, target, reduction="none"))
    assert sq.shape == pred.shape
    assert np.allclose(np.asarray(sq), np.asarray(sq_ref), rtol=1e-4, atol=1e-6)

    print("KERNEL_OK")
</pallas_src>

<mosaic_0001>
module attributes {stable_mosaic.version = 11 : i64} {
  func.func @_partial_sum_kernel(%arg0: i32, %arg1: memref<16x128xf32, #tpu.memory_space<vmem>>, %arg2: memref<16x128xf32, #tpu.memory_space<vmem>>, %arg3: memref<1x8x128xf32, #tpu.memory_space<vmem>>) attributes {dimension_semantics = [#tpu.dimension_semantics<parallel>], iteration_bounds = array<i64: 1>, scalar_prefetch = 0 : i64, scratch_operands = 0 : i64, tpu.core_type = #tpu.core_type<tc>, window_params = [{transform_indices = @transform_0, window_bounds = array<i64: 16, 128>}, {transform_indices = @transform_1, window_bounds = array<i64: 16, 128>}, {transform_indices = @transform_2, window_bounds = array<i64: 1, 8, 128>}]} {
    %c0 = arith.constant 0 : index
    %c0_0 = arith.constant 0 : index
    %0 = vector.load %arg1[%c0, %c0_0] : memref<16x128xf32, #tpu.memory_space<vmem>>, vector<16x128xf32>
    %c0_1 = arith.constant 0 : index
    %c0_2 = arith.constant 0 : index
    %1 = vector.load %arg2[%c0_1, %c0_2] : memref<16x128xf32, #tpu.memory_space<vmem>>, vector<16x128xf32>
    %cst = arith.constant 5.000000e-01 : f32
    %2 = vector.broadcast %cst : f32 to vector<16x128xf32>
    %3 = arith.mulf %2, %0 : vector<16x128xf32>
    %4 = math.tanh %3 : vector<16x128xf32>
    %cst_3 = arith.constant 5.000000e-01 : f32
    %5 = vector.broadcast %cst_3 : f32 to vector<16x128xf32>
    %6 = arith.mulf %5, %1 : vector<16x128xf32>
    %7 = math.tanh %6 : vector<16x128xf32>
    %8 = arith.subf %4, %7 : vector<16x128xf32>
    %cst_4 = arith.constant 5.000000e-01 : f32
    %9 = vector.broadcast %cst_4 : f32 to vector<16x128xf32>
    %10 = arith.mulf %9, %8 : vector<16x128xf32>
    %11 = arith.mulf %10, %10 : vector<16x128xf32>
    %12 = vector.shape_cast %11 : vector<16x128xf32> to vector<2x8x128xf32>
    %cst_5 = arith.constant dense<0.000000e+00> : vector<8x128xf32>
    %13 = vector.multi_reduction <add>, %12, %cst_5 [0] : vector<2x8x128xf32> to vector<8x128xf32>
    %c0_6 = arith.constant 0 : index
    %c0_7 = arith.constant 0 : index
    %c0_8 = arith.constant 0 : index
    %14 = vector.load %arg3[%c0_6, %c0_7, %c0_8] : memref<1x8x128xf32, #tpu.memory_space<vmem>>, vector<1x8x128xf32>
    %15 = vector.shape_cast %14 : vector<1x8x128xf32> to vector<8x128xf32>
    %16 = vector.shape_cast %13 : vector<8x128xf32> to vector<1x8x128xf32>
    tpu.vector_store %arg3[%c0_6, %c0_7, %c0_8], %16 {strides = array<i32>} : memref<1x8x128xf32, #tpu.memory_space<vmem>>, vector<1x8x128xf32>,
    return
  }
  func.func @transform_0(%arg0: i32) -> (i32, i32) {
    %c0_i32 = arith.constant 0 : i32
    %c0_i32_0 = arith.constant 0 : i32
    return %arg0, %c0_i32 : i32, i32
  }
  func.func @transform_1(%arg0: i32) -> (i32, i32) {
    %c0_i32 = arith.constant 0 : i32
    %c0_i32_0 = arith.constant 0 : i32
    return %arg0, %c0_i32 : i32, i32
  }
  func.func @transform_2(%arg0: i32) -> (i32, i32, i32) {
    %c0_i32 = arith.constant 0 : i32
    %c0_i32_0 = arith.constant 0 : i32
    %c0_i32_1 = arith.constant 0 : i32
    return %arg0, %c0_i32, %c0_i32_0 : i32, i32, i32
  }
}

</mosaic_0001>

<bundles_post_ra>
// kernel: tpu_custom_call.1
= control target key start
LH: loop header
LB: loop body
LE: loop exit
PB: predicated region body
PF: predicated region fallthrough
CT: control target
= control target key end

     0   :  { %7 = vsyncpa [#allocation3], 0  ;;  %s184_s0 = inlined_call_operand.hbm [shape: f32[16,128], index: 0, kind: input, shape index: {}]   ;;  %s185_s1 = inlined_call_operand.hbm [shape: f32[16,128], index: 1, kind: input, shape index: {}]   ;;  %s186_s2 = inlined_call_operand.hbm [shape: f32[1,8,128], index: 2, kind: output, shape index: {}]  }
   0x1   :  { %8 = vsyncpa [#allocation6], 0 }
   0x2   :  { %9 = vsyncpa [#allocation4], 0  ;;  %s155_s9 = smov [#allocation2]  }
   0x3   :  { %s15_s10 = sshll.u32 %s155_s9, 4  ;;  %s16_s10 = int_to_ptr.vmem [resolvable:$true] %s15_s10 }
   0x4   :  { %s97_s11 = scalar_lea.vmem %s16_s10, 256  ;;  %p102_p1 = scmp.lt.s32.totalorder %s16_s10, %s16_s10 }
   0x5   :  { %p98_p0 = scmp.ne.s32.totalorder %s16_s10, %s97_s11  ;;  %p103_p2 = scmp.lt.s32.totalorder %s97_s11, %s97_s11 }
   0x7   :  { %p104_p3 = por %p103_p2, %p102_p1 }
   0x9   :  { %p105_p4 = pnand %p104_p3, %p98_p0 }
   0xb   :  { %108 = shalt.err (!%p105_p4)
}
   0xc   :  { %s156_s12 = smov 128   ;;  %s157_s13 = smov 8  }
   0xd   :  { %21 = dma.hbm_to_vmem [thread:$0]  %s184_s0, 256, %s16_s10, [#allocation3], %s156_s12, %s156_s12, %s157_s13  }
   0xe   :  { %s158_s16 = smov [#allocation5]  }
   0xf   :  { %s27_s17 = sshll.u32 %s158_s16, 4  ;;  %s28_s17 = int_to_ptr.vmem [resolvable:$true] %s27_s17 }
  0x10   :  { %s117_s18 = scalar_lea.vmem %s28_s17, 256  ;;  %p122_p6 = scmp.lt.s32.totalorder %s28_s17, %s28_s17 }
  0x11   :  { %p118_p5 = scmp.ne.s32.totalorder %s28_s17, %s117_s18  ;;  %p123_p7 = scmp.lt.s32.totalorder %s117_s18, %s117_s18 }
  0x13   :  { %p124_p8 = por %p123_p7, %p122_p6 }
  0x15   :  { %p125_p9 = pnand %p124_p8, %p118_p5 }
  0x17   :  { %128 = shalt.err (!%p125_p9)
}
  0x18   :  { %33 = dma.hbm_to_vmem [thread:$0]  %s185_s1, 256, %s28_s17, [#allocation6], %s156_s12, %s156_s12, %s157_s13  }
  0x19   :  { %149 = dma.done.wait [#allocation3], 256  }
  0x1a   :  { %150 = vsyncadd [#allocation3], 4294967040 }
  0x1b   :  { %151 = dma.done.wait [#allocation6], 256  }
  0x1c   :  { %152 = vsyncadd [#allocation6], 4294967040  ;;  %v40_v0 = vld [vmem:[#allocation2] sm:$0xff]  ;;  %v41_v1 = vld [vmem:[#allocation2 + $0x8] sm:$0xff]  ;;  %s159_s0 = smov [#allocation7]  }
  0x1d   :  { %v42_v2 = vld [vmem:[#allocation5] sm:$0xff]  ;;  %v43_v3 = vld [vmem:[#allocation5 + $0x8] sm:$0xff]  ;;  %v44_v4 = vmul.f32 0.5, %v40_v0  ;;  %v45_v5 = vmul.f32 0.5, %v41_v1  ;;  %s66_s1 = sshll.u32 %s159_s0, 4  ;;  %s67_s1 = int_to_ptr.vmem [resolvable:$true] %s66_s1 }
  0x1e   :  { %v48_v6 = vmul.f32 0.5, %v42_v2  ;;  %v49_v7 = vmul.f32 0.5, %v43_v3  ;;  %s129_s21 = scalar_lea.vmem %s67_s1, 128  ;;  %p134_p11 = scmp.lt.s32.totalorder %s67_s1, %s67_s1 }
  0x1f   :  { %81 = vtanh.f32 %v44_v4  ;;  %p130_p10 = scmp.ne.s32.totalorder %s67_s1, %s129_s21  ;;  %p135_p12 = scmp.lt.s32.totalorder %s129_s21, %s129_s21 }
  0x20   :  { %83 = vtanh.f32 %v45_v5 }
  0x21   :  { %85 = vtanh.f32 %v48_v6  ;;  %p136_p13 = por %p135_p12, %p134_p11 }
  0x22   :  { %87 = vtanh.f32 %v49_v7 }
  0x23   :  { %p137_p0 = pnand %p136_p13, %p130_p10 }
  0x2c   :  { %v82_v8 = vpop.eup %81 }
  0x2d   :  { %v84_v9 = vpop.eup %83 }
  0x2e   :  { %v86_v10 = vpop.eup %85 }
  0x2f   :  { %v88_v11 = vpop.eup %87  ;;  %v52_v12 = vsub.f32 %v82_v8, %v86_v10 }
  0x30   :  { %v53_v13 = vsub.f32 %v84_v9, %v88_v11 }
  0x31   :  { %v54_v14 = vmul.f32 0.5, %v52_v12 }
  0x32   :  { %v55_v15 = vmul.f32 0.5, %v53_v13 }
  0x33   :  { %v56_v16 = vmul.f32 %v54_v14, %v54_v14 }
  0x34   :  { %v57_v17 = vmul.f32 %v55_v15, %v55_v15 }
  0x36   :  { %v58_v18 = vadd.f32 %v57_v17, %v56_v16 }
  0x38   :  { %59 = vst [vmem:[#allocation7] sm:$0xff] %v58_v18 }
  0x39   :  { %140 = shalt.err (!%p137_p0)
}
  0x3a   :  { %69 = dma.vmem_to_hbm [thread:$0]  %s67_s1, 128, %s186_s2, [#allocation4]  }
  0x3b   :  { %153 = dma.done.wait [#allocation4], 128  }
  0x3c   :  { %154 = vsyncadd [#allocation4], 4294967168 }
  0x3d   :  { %73 = vsyncpa [#allocation3], 1 }
  0x3e   :  { %74 = vsyncpa [#allocation6], 1 }
  0x3f   :  { %75 = vsyncpa [#allocation4], 1 }

</bundles_post_ra>
